<compile_context>
chip_gen: v6e
topology: v6e:2x2x1
jax: 0.10.0
libtpu: 0.0.40
codegen_flags: <defaults>
</compile_context>

<pallas_src>
import functools
import math

import jax
import jax.numpy as jnp
from jax import lax
from jax.experimental import pallas as pl
from jax.experimental.pallas import tpu as pltpu


# --------------------------------------------------------------------------- #
# Kernel
# --------------------------------------------------------------------------- #
def _fc_kernel(x_ref, w_ref, b_ref, o_ref, acc_ref, *, w_is_kn):
    # x_ref:  [tm, tk]    activation tile
    # w_ref:  [tn, tk]    (PyTorch layout)  or  [tk, tn] if pre-transposed
    # b_ref:  [1,  tn]    bias tile (float32)
    # o_ref:  [tm, tn]    output tile
    # acc_ref:[tm, tn]    float32 accumulator, resident across the K grid axis
    k = pl.program_id(2)

    @pl.when(k == 0)
    def _init():
        acc_ref[...] = jnp.zeros_like(acc_ref)

    if w_is_kn:
        dn = (((1,), (0,)), ((), ()))          # [tm,tk] x [tk,tn]
    else:
        dn = (((1,), (1,)), ((), ()))          # [tm,tk] x [tn,tk]  (x @ W.T)
    acc_ref[...] += lax.dot_general(
        x_ref[...], w_ref[...],
        dimension_numbers=dn,
        preferred_element_type=jnp.float32)

    @pl.when(k == pl.num_programs(2) - 1)
    def _finalize():
        o_ref[...] = (acc_ref[...] + b_ref[...]).astype(o_ref.dtype)


# --------------------------------------------------------------------------- #
# Tiling helpers
# --------------------------------------------------------------------------- #
def _round_up(v, m):
    return ((v + m - 1) // m) * m


def _cdiv(a, b):
    return -(-a // b)


def _balanced_tile(total, unit, cap):
    """Lane/sublane-aligned tile that splits `total` into equal-ish chunks <= cap."""
    t = _round_up(max(total, 1), unit)
    steps = _cdiv(t, cap)
    return _round_up(_cdiv(t, steps), unit)


def _working_set_bytes(tm, tn, tk, in_item, out_item, w_nbuf):
    return (tm * tk * in_item * 2          # x tile, double-buffered
            + tn * tk * in_item * w_nbuf   # W tile
            + tn * 4 * 2                   # bias tile
            + tm * tn * out_item * 2       # output tile
            + tm * tn * 4)                 # f32 accumulator scratch


def _vmem_capacity_bytes():
    try:
        info = pltpu.get_tpu_info()
        cap = getattr(info, "vmem_capacity_bytes", None)
        if cap:
            return int(cap)
    except Exception:
        pass
    return 64 * 1024 * 1024   # conservative fallback: v7x per-TC VMEM


# --------------------------------------------------------------------------- #
# Wrapper
# --------------------------------------------------------------------------- #
def fc_forward(x, weight, bias, *, compute_dtype=None, pretranspose_weight=False):
    """Linear layer: x @ weight.T + bias.

    x:      [B, n_in]
    weight: [n_out, n_in]   (PyTorch convention)
    bias:   [n_out]
    compute_dtype: cast x/weight (e.g. jnp.bfloat16) for the MXU fast path;
                   accumulation stays f32, output keeps x's original dtype.
    pretranspose_weight: feed W as [n_in, n_out] and do a plain [M,K]x[K,N]
                   contraction (avoids any rhs relayout at the cost of one
                   wrapper-side transpose; useful for reused weights).
    """
    B, n_in = x.shape
    n_out, n_in_w = weight.shape
    assert n_in_w == n_in, (weight.shape, x.shape)
    out_dtype = x.dtype

    if compute_dtype is not None:
        x = x.astype(compute_dtype)
        weight = weight.astype(compute_dtype)
    cdtype = x.dtype
    bias = bias.astype(jnp.float32)

    sub = 16 if cdtype == jnp.bfloat16 else 8
    lane = 128
    in_item = jnp.dtype(cdtype).itemsize
    out_item = jnp.dtype(out_dtype).itemsize

    vmem_cap = _vmem_capacity_bytes()
    budget = int(vmem_cap * 0.45)            # working-set budget for tiles

    # --- tile selection (generation-aware via VMEM budget) ------------------
    gemv = B <= sub                           # tiny-batch weight-streaming regime
    tm_cap = 512
    tn_cap = 1024 if gemv else 512
    tk_cap = (_round_up(n_in, lane) if gemv   # full K if budget allows
              else (2048 if cdtype == jnp.bfloat16 else 1024))
    w_nbuf = 3 if gemv else 2                 # weight buffering depth

    tm = _balanced_tile(B, sub, tm_cap)
    tn = _balanced_tile(n_out, lane, tn_cap)
    tk = _balanced_tile(n_in, lane, tk_cap)

    # Shrink (K first, then N, then M) until the buffered working set fits.
    while _working_set_bytes(tm, tn, tk, in_item, out_item, w_nbuf) > budget:
        if tk > lane:
            tk = _balanced_tile(n_in, lane, max(lane, tk // 2))
        elif tn > lane:
            tn = _balanced_tile(n_out, lane, max(lane, tn // 2))
        elif tm > sub:
            tm = _balanced_tile(B, sub, max(sub, tm // 2))
        else:
            break

    # Guarantee >=2 output blocks so both TensorCores (v7x) get work.
    if _cdiv(B, tm) * _cdiv(n_out, tn) < 2:
        if tn > lane:
            tn = _round_up(_cdiv(tn, 2), lane)
        elif tm > sub:
            tm = _round_up(_cdiv(tm, 2), sub)

    Mp = tm * _cdiv(B, tm)
    Np = tn * _cdiv(n_out, tn)
    Kp = tk * _cdiv(n_in, tk)

    # --- padding to tile multiples (K zeros are exact; M/N sliced off) ------
    if (Mp, Kp) != (B, n_in):
        x = jnp.pad(x, ((0, Mp - B), (0, Kp - n_in)))
    if (Np, Kp) != (n_out, n_in):
        weight = jnp.pad(weight, ((0, Np - n_out), (0, Kp - n_in)))
    b2 = jnp.pad(bias, (0, Np - n_out)).reshape(1, Np)

    if pretranspose_weight:
        weight = weight.T                     # [Kp, Np]
        w_shape, w_map = (tk, tn), (lambda i, j, k: (k, j))
    else:
        w_shape, w_map = (tn, tk), (lambda i, j, k: (j, k))

    grid = (Mp // tm, Np // tn, Kp // tk)     # reduction (K) axis last
    m_blocks, n_blocks, _ = grid

    # Deeper weight buffering in the GEMV regime (pure weight streaming).
    if gemv and n_blocks >= 3:
        try:
            w_spec = pl.BlockSpec(w_shape, w_map, pipeline_mode=pl.Buffered(3))
        except TypeError:                     # older jax: kwarg unsupported
            w_spec = pl.BlockSpec(w_shape, w_map)
    else:
        w_spec = pl.BlockSpec(w_shape, w_map)

    ws = _working_set_bytes(tm, tn, tk, in_item, out_item, w_nbuf)
    vmem_limit = min(int(vmem_cap * 0.75), max(64 << 20, ws + (16 << 20)))

    # Advisory cost: count actual re-streamed HBM traffic, not one pass each.
    cost = pl.CostEstimate(
        flops=2 * B * n_in * n_out,
        transcendentals=0,
        bytes_accessed=int(int(x.size) * in_item * n_blocks
                           + int(weight.size) * in_item * m_blocks
                           + int(b2.size) * 4
                           + Mp * Np * out_item),
    )

    kernel = functools.partial(_fc_kernel, w_is_kn=pretranspose_weight)

    out_padded = pl.pallas_call(
        kernel,
        out_shape=jax.ShapeDtypeStruct((Mp, Np), out_dtype),
        grid_spec=pltpu.PrefetchScalarGridSpec(
            num_scalar_prefetch=0,
            grid=grid,
            in_specs=[
                pl.BlockSpec((tm, tk), lambda i, j, k: (i, k)),  # x tile
                w_spec,                                          # W tile
                pl.BlockSpec((1, tn), lambda i, j, k: (0, j)),   # bias slice
            ],
            out_specs=pl.BlockSpec((tm, tn), lambda i, j, k: (i, j)),
            scratch_shapes=[pltpu.VMEM((tm, tn), jnp.float32)],
        ),
        compiler_params=pltpu.CompilerParams(
            dimension_semantics=("parallel", "parallel", "arbitrary"),
            vmem_limit_bytes=int(vmem_limit),
            allow_input_fusion=[True, True, True],
        ),
        cost_estimate=cost,
    )(x, weight, b2)

    return out_padded[:B, :n_out]


# --------------------------------------------------------------------------- #
# Self-test
# --------------------------------------------------------------------------- #
if __name__ == "__main__":
    def make_case(seed, B, n_in, n_out):
        kx, kw, kb = jax.random.split(jax.random.PRNGKey(seed), 3)
        bound = 1.0 / math.sqrt(n_in)           # nn.Linear-style init
        w = jax.random.uniform(kw, (n_out, n_in), jnp.float32, -bound, bound)
        b = jax.random.uniform(kb, (n_out,), jnp.float32, -bound, bound)
        x = jax.random.normal(kx, (B, n_in), jnp.float32)
        ref = jnp.dot(x, w.T, precision=lax.Precision.HIGHEST) + b
        return x, w, b, ref

    # 1) Small shapes consistent with FC(n_in, n_out): single-tile path.
    x, w, b, ref = make_case(0, 8, 32, 16)
    out = jax.block_until_ready(fc_forward(x, w, b))
    assert out.shape == (8, 16)
    assert jnp.allclose(out, ref, atol=5e-3, rtol=5e-3)

    # bf16 fast path (f32 accumulation) — looser tolerance.
    out_bf16 = jax.block_until_ready(fc_forward(x, w, b, compute_dtype=jnp.bfloat16))
    assert jnp.allclose(out_bf16, ref, atol=5e-2, rtol=5e-2)

    # 2) Medium shapes: multi-block grid (K reduction + >=2 output blocks).
    x2, w2, b2, ref2 = make_case(1, 300, 1200, 500)
    out2 = jax.block_until_ready(fc_forward(x2, w2, b2))
    assert out2.shape == (300, 500)
    assert jnp.allclose(out2, ref2, atol=1e-2, rtol=1e-2)

    # Pre-transposed weight variant (plain [M,K]x[K,N] contraction).
    out2t = jax.block_until_ready(fc_forward(x2, w2, b2, pretranspose_weight=True))
    assert jnp.allclose(out2t, ref2, atol=1e-2, rtol=1e-2)

    # 3) GEMV regime (tiny B, wide output): full-K tiles + buffered weights.
    x3, w3, b3, ref3 = make_case(2, 4, 1024, 4096)
    out3 = jax.block_until_ready(fc_forward(x3, w3, b3))
    assert out3.shape == (4, 4096)
    assert jnp.allclose(out3, ref3, atol=1e-2, rtol=1e-2)

    print("KERNEL_OK")
</pallas_src>

<mosaic_0001>
module attributes {stable_mosaic.version = 11 : i64} {
  func.func @_fc_kernel(%arg0: i32, %arg1: i32, %arg2: i32, %arg3: memref<8x128xf32, #tpu.memory_space<vmem>>, %arg4: memref<128x128xf32, #tpu.memory_space<vmem>>, %arg5: memref<1x128xf32, #tpu.memory_space<vmem>>, %arg6: memref<8x128xf32, #tpu.memory_space<vmem>>, %arg7: memref<8x128xf32, #tpu.memory_space<vmem>>) attributes {dimension_semantics = [#tpu.dimension_semantics<parallel>, #tpu.dimension_semantics<parallel>, #tpu.dimension_semantics<arbitrary>], iteration_bounds = array<i64: 1, 1, 1>, scalar_prefetch = 0 : i64, scratch_operands = 1 : i64, tpu.core_type = #tpu.core_type<tc>, window_params = [{transform_indices = @transform_0, window_bounds = array<i64: 8, 128>}, {transform_indices = @transform_1, window_bounds = array<i64: 128, 128>}, {transform_indices = @transform_2, window_bounds = array<i64: 1, 128>}, {transform_indices = @transform_3, window_bounds = array<i64: 8, 128>}]} {
    %c0_i32 = arith.constant 0 : i32
    %0 = arith.cmpi eq, %arg2, %c0_i32 : i32
    %1 = arith.extui %0 : i1 to i32
    %c0_i32_0 = arith.constant 0 : i32
    %2 = arith.cmpi ne, %1, %c0_i32_0 : i32
    scf.if %2 {
      %cst_10 = arith.constant 0.000000e+00 : f32
      %12 = vector.broadcast %cst_10 : f32 to vector<8x128xf32>
      %c0_11 = arith.constant 0 : index
      %c0_12 = arith.constant 0 : index
      %13 = vector.load %arg7[%c0_11, %c0_12] : memref<8x128xf32, #tpu.memory_space<vmem>>, vector<8x128xf32>
      tpu.vector_store %arg7[%c0_11, %c0_12], %12 {strides = array<i32>} : memref<8x128xf32, #tpu.memory_space<vmem>>, vector<8x128xf32>,
    } else {
    }
    %c0 = arith.constant 0 : index
    %c0_1 = arith.constant 0 : index
    %3 = vector.load %arg7[%c0, %c0_1] : memref<8x128xf32, #tpu.memory_space<vmem>>, vector<8x128xf32>
    %c0_2 = arith.constant 0 : index
    %c0_3 = arith.constant 0 : index
    %4 = vector.load %arg3[%c0_2, %c0_3] : memref<8x128xf32, #tpu.memory_space<vmem>>, vector<8x128xf32>
    %c0_4 = arith.constant 0 : index
    %c0_5 = arith.constant 0 : index
    %5 = vector.load %arg4[%c0_4, %c0_5] : memref<128x128xf32, #tpu.memory_space<vmem>>, vector<128x128xf32>
    %cst = arith.constant dense<0.000000e+00> : vector<8x128xf32>
    %6 = tpu.matmul %4, %5, %cst {dimension_numbers = #tpu.dot_dimension_numbers<[1], [1], [0], [0], [0, 0, 1, 0], [], []>} : vector<8x128xf32>, vector<128x128xf32>, vector<8x128xf32> -> vector<8x128xf32>
    %7 = arith.addf %3, %6 : vector<8x128xf32>
    %c0_6 = arith.constant 0 : index
    %c0_7 = arith.constant 0 : index
    %8 = vector.load %arg7[%c0_6, %c0_7] : memref<8x128xf32, #tpu.memory_space<vmem>>, vector<8x128xf32>
    tpu.vector_store %arg7[%c0_6, %c0_7], %7 {strides = array<i32>} : memref<8x128xf32, #tpu.memory_space<vmem>>, vector<8x128xf32>,
    %c0_i32_8 = arith.constant 0 : i32
    %9 = arith.cmpi eq, %arg2, %c0_i32_8 : i32
    %10 = arith.extui %9 : i1 to i32
    %c0_i32_9 = arith.constant 0 : i32
    %11 = arith.cmpi ne, %10, %c0_i32_9 : i32
    scf.if %11 {
      %c0_10 = arith.constant 0 : index
      %c0_11 = arith.constant 0 : index
      %12 = vector.load %arg7[%c0_10, %c0_11] : memref<8x128xf32, #tpu.memory_space<vmem>>, vector<8x128xf32>
      %c0_12 = arith.constant 0 : index
      %c0_13 = arith.constant 0 : index
      %13 = vector.load %arg5[%c0_12, %c0_13] : memref<1x128xf32, #tpu.memory_space<vmem>>, vector<1x128xf32>
      %14 = vector.broadcast %13 : vector<1x128xf32> to vector<8x128xf32>
      %15 = arith.addf %12, %14 : vector<8x128xf32>
      %c0_14 = arith.constant 0 : index
      %c0_15 = arith.constant 0 : index
      %16 = vector.load %arg6[%c0_14, %c0_15] : memref<8x128xf32, #tpu.memory_space<vmem>>, vector<8x128xf32>
      tpu.vector_store %arg6[%c0_14, %c0_15], %15 {strides = array<i32>} : memref<8x128xf32, #tpu.memory_space<vmem>>, vector<8x128xf32>,
    } else {
    }
    return
  }
  func.func @transform_0(%arg0: i32, %arg1: i32, %arg2: i32) -> (i32, i32) {
    %c0_i32 = arith.constant 0 : i32
    return %arg0, %arg2 : i32, i32
  }
  func.func @transform_1(%arg0: i32, %arg1: i32, %arg2: i32) -> (i32, i32) {
    %c0_i32 = arith.constant 0 : i32
    return %arg1, %arg2 : i32, i32
  }
  func.func @transform_2(%arg0: i32, %arg1: i32, %arg2: i32) -> (i32, i32) {
    %c0_i32 = arith.constant 0 : i32
    %c0_i32_0 = arith.constant 0 : i32
    return %c0_i32, %arg1 : i32, i32
  }
  func.func @transform_3(%arg0: i32, %arg1: i32, %arg2: i32) -> (i32, i32) {
    %c0_i32 = arith.constant 0 : i32
    return %arg0, %arg1 : i32, i32
  }
}

</mosaic_0001>

<bundles_post_ra>
// kernel: tpu_custom_call.1
= control target key start
LH: loop header
LB: loop body
LE: loop exit
PB: predicated region body
PF: predicated region fallthrough
CT: control target
= control target key end

     0   :  { %8 = vsyncpa [#allocation4], 0  ;;  %s330_s0 = inlined_call_operand.hbm [shape: f32[8,128], index: 0, kind: input, shape index: {}]   ;;  %s331_s1 = inlined_call_operand.hbm [shape: f32[128,128], index: 1, kind: input, shape index: {}]   ;;  %s332_s2 = inlined_call_operand.vmem [shape: f32[1,128], index: 2, kind: input, shape index: {}]   ;;  %s333_s3 = inlined_call_operand.hbm [shape: f32[8,128], index: 3, kind: output, shape index: {}]  }
   0x1   :  { %9 = vsyncpa [#allocation7], 0 }
   0x2   :  { %10 = vsyncpa [#allocation5], 0  ;;  %s291_s12 = smov [#allocation3]   ;;  %s292_s14 = smov [#allocation6]  }
   0x3   :  { %s17_s13 = sshll.u32 %s291_s12, 4  ;;  %s26_s15 = sshll.u32 %s292_s14, 4  ;;  %s18_s13 = int_to_ptr.vmem [resolvable:$true] %s17_s13  ;;  %s27_s15 = int_to_ptr.vmem [resolvable:$true] %s26_s15 }
   0x4   :  { %s233_s16 = scalar_lea.vmem %s18_s13, 128  ;;  %p238_p1 = scmp.lt.s32.totalorder %s18_s13, %s18_s13 }
   0x5   :  { %p234_p0 = scmp.ne.s32.totalorder %s18_s13, %s233_s16  ;;  %p239_p2 = scmp.lt.s32.totalorder %s233_s16, %s233_s16 }
   0x7   :  { %p240_p3 = por %p239_p2, %p238_p1 }
   0x9   :  { %p241_p4 = pnand %p240_p3, %p234_p0 }
   0xb   :  { %244 = shalt.err (!%p241_p4)
}
   0xc   :  { %20 = dma.hbm_to_vmem [thread:$0]  %s330_s0, 128, %s18_s13, [#allocation4]  }
   0xd   :  { %s253_s19 = scalar_lea.vmem %s27_s15, 2048  ;;  %p258_p6 = scmp.lt.s32.totalorder %s27_s15, %s27_s15 }
   0xe   :  { %p254_p5 = scmp.ne.s32.totalorder %s27_s15, %s253_s19  ;;  %p259_p7 = scmp.lt.s32.totalorder %s253_s19, %s253_s19 }
  0x10   :  { %p260_p8 = por %p259_p7, %p258_p6 }
  0x12   :  { %p261_p9 = pnand %p260_p8, %p254_p5 }
  0x14   :  { %264 = shalt.err (!%p261_p9)
}
  0x15   :  { %s293_s20 = smov 128   ;;  %s294_s21 = smov 8  }
  0x16   :  { %32 = dma.hbm_to_vmem [thread:$0]  %s331_s1, 2048, %s27_s15, [#allocation7], %s293_s20, %s293_s20, %s294_s21  }
  0x17   :  { %285 = dma.done.wait [#allocation4], 128  }
  0x18   :  { %286 = vsyncadd [#allocation4], 4294967168 }
  0x19   :  { %287 = dma.done.wait [#allocation7], 2048  }
  0x1a   :  { %288 = vsyncadd [#allocation7], 4294965248  ;;  %v295_v0 = vmov 0.0   ;;  %vm296_vm0 = vmmov 0   ;;  %v63_v1 = vld [vmem:[#allocation6 + $0x78] sm:$0xff]  ;;  %v62_v2 = vld [vmem:[#allocation6 + $0x70] sm:$0xff] }
  0x1b   :  { %183 = vmatprep.subr.mxu0 %v295_v0  ;;  %215 = vmatprep.mubr.msk.f32.mxu0 %vm296_vm0, %v295_v0  ;;  %v61_v3 = vld [vmem:[#allocation6 + $0x68] sm:$0xff]  ;;  %v60_v4 = vld [vmem:[#allocation6 + $0x60] sm:$0xff]  ;;  %v59_v5 = vld [vmem:[#allocation6 + $0x58] sm:$0xff]  ;;  %s297_s24 = smov [#allocation8]  }
  0x1c   :  { %184 = vmatpush3.xpose.msra.mxu0 %v63_v1  ;;  %v58_v6 = vld [vmem:[#allocation6 + $0x50] sm:$0xff]  ;;  %v57_v7 = vld [vmem:[#allocation6 + $0x48] sm:$0xff]  ;;  %v56_v8 = vld [vmem:[#allocation6 + $0x40] sm:$0xff]  ;;  %s155_s25 = sshll.u32 %s297_s24, 4  ;;  %s156_s25 = int_to_ptr.vmem [resolvable:$true] %s155_s25 }
  0x1d   :  { %185 = vmatprep.subr.mxu0 %v295_v0  ;;  %v55_v9 = vld [vmem:[#allocation6 + $0x38] sm:$0xff]  ;;  %v54_v10 = vld [vmem:[#allocation6 + $0x30] sm:$0xff]  ;;  %v53_v11 = vld [vmem:[#allocation6 + $0x28] sm:$0xff]  ;;  %s265_s26 = scalar_lea.vmem %s156_s25, 128  ;;  %p270_p11 = scmp.lt.s32.totalorder %s156_s25, %s156_s25 }
  0x1e   :  { %v52_v12 = vld [vmem:[#allocation6 + $0x20] sm:$0xff]  ;;  %v51_v13 = vld [vmem:[#allocation6 + $0x18] sm:$0xff]  ;;  %v50_v14 = vld [vmem:[#allocation6 + $0x10] sm:$0xff]  ;;  %p266_p10 = scmp.ne.s32.totalorder %s156_s25, %s265_s26  ;;  %p271_p12 = scmp.lt.s32.totalorder %s265_s26, %s265_s26 }
  0x1f   :  { %v49_v15 = vld [vmem:[#allocation6 + $0x8] sm:$0xff]  ;;  %v48_v16 = vld [vmem:[#allocation6] sm:$0xff]  ;;  %v47_v17 = vld [vmem:[#allocation3] sm:$0xff] }
  0x20   :  { %186 = vmatpush3.xpose.msra.mxu0 %v62_v2  ;;  %v165_v18 = vld [vmem:[%s332_s2] ss:$0 sm:$0xff]  ;;  %p272_p13 = por %p271_p12, %p270_p11 }
  0x21   :  { %187 = vmatprep.subr.mxu0 %v295_v0 }
  0x22   :  { %p273_p0 = pnand %p272_p13, %p266_p10 }
  0x24   :  { %188 = vmatpush3.xpose.msra.mxu0 %v61_v3 }
  0x25   :  { %189 = vmatprep.subr.mxu0 %v295_v0 }
  0x28   :  { %190 = vmatpush3.xpose.msra.mxu0 %v60_v4 }
  0x29   :  { %191 = vmatprep.subr.mxu0 %v295_v0 }
  0x2c   :  { %192 = vmatpush3.xpose.msra.mxu0 %v59_v5 }
  0x2d   :  { %193 = vmatprep.subr.mxu0 %v295_v0 }
  0x30   :  { %194 = vmatpush3.xpose.msra.mxu0 %v58_v6 }
  0x31   :  { %195 = vmatprep.subr.mxu0 %v295_v0 }
  0x34   :  { %196 = vmatpush3.xpose.msra.mxu0 %v57_v7 }
  0x35   :  { %197 = vmatprep.subr.mxu0 %v295_v0 }
  0x38   :  { %198 = vmatpush3.xpose.msra.mxu0 %v56_v8 }
  0x39   :  { %199 = vmatprep.subr.mxu0 %v295_v0 }
  0x3c   :  { %200 = vmatpush3.xpose.msra.mxu0 %v55_v9 }
  0x3d   :  { %201 = vmatprep.subr.mxu0 %v295_v0 }
  0x40   :  { %202 = vmatpush3.xpose.msra.mxu0 %v54_v10 }
  0x41   :  { %203 = vmatprep.subr.mxu0 %v295_v0 }
  0x44   :  { %204 = vmatpush3.xpose.msra.mxu0 %v53_v11 }
  0x45   :  { %205 = vmatprep.subr.mxu0 %v295_v0 }
  0x48   :  { %206 = vmatpush3.xpose.msra.mxu0 %v52_v12 }
  0x49   :  { %207 = vmatprep.subr.mxu0 %v295_v0 }
  0x4c   :  { %208 = vmatpush3.xpose.msra.mxu0 %v51_v13 }
  0x4d   :  { %209 = vmatprep.subr.mxu0 %v295_v0 }
  0x50   :  { %210 = vmatpush3.xpose.msra.mxu0 %v50_v14 }
  0x51   :  { %211 = vmatprep.subr.mxu0 %v295_v0 }
  0x54   :  { %212 = vmatpush3.xpose.msra.mxu0 %v49_v15 }
  0x55   :  { %213 = vmatprep.subr.mxu0 %v295_v0 }
  0x58   :  { %214 = vmatpush3.xpose.msra.mxu0 %v48_v16 }
  0x5b   :  { %216 = vmatmul.mubr.f32.vlgmr.msra.gmra.mxu0 %v47_v17 }
 0x11b   :  { %v130_v19 = vpop.f32.mrf.mxu0 }
 0x11c   :  { %v147_v20 = vadd.f32 %v165_v18, %v130_v19 }
 0x11d   :  { %v217_v21 = vpop.f32.mrf.mxu0 }
 0x11e   :  { %148 = vst [vmem:[#allocation8] sm:$0xff] %v147_v20 }
 0x11f   :  { %276 = shalt.err (!%p273_p0)
}
 0x120   :  { %158 = dma.vmem_to_hbm [thread:$0]  %s156_s25, 128, %s333_s3, [#allocation5]  }
 0x121   :  { %289 = dma.done.wait [#allocation5], 128  }
 0x122   :  { %290 = vsyncadd [#allocation5], 4294967168 }
 0x123   :  { %162 = vsyncpa [#allocation4], 1 }
 0x124   :  { %163 = vsyncpa [#allocation7], 1 }
 0x125   :  { %164 = vsyncpa [#allocation5], 1 }

</bundles_post_ra>
